<compile_context>
chip_gen: v5e
topology: v5e:2x2
jax: 0.10.0
libtpu: 0.0.40
codegen_flags: <defaults>
</compile_context>

<pallas_src>
import jax
import jax.numpy as jnp
from jax.experimental import pallas as pl
from jax.experimental.pallas import tpu as pltpu


def saliency_kernel(mask_ref, w1_ref, w2_ref, out_ref):
    # mask_ref: (BM, HID)    relu'(z1) as 0/1 floats for BM examples
    # w1_ref  : (HID, DT)    one D-tile of W1
    # w2_ref  : (K, HID)
    # out_ref : (BM*K, DT)   Jacobian rows, lane-dense on D
    BM, HID = mask_ref.shape
    K = w2_ref.shape[0]

    mask = mask_ref[...]                         # (BM, HID)
    w2 = w2_ref[...]                             # (K, HID)

    # J_b = W2 @ diag(mask_b) @ W1 == (W2 * mask_b) @ W1 for each example b.
    # Build all masked W2's (VPU), merge (b, k) into rows, ONE MXU matmul.
    w2m = w2[None, :, :] * mask[:, None, :]      # (BM, K, HID)
    w2m_flat = w2m.reshape(BM * K, HID)          # (BM*K, HID)

    out_ref[...] = jnp.dot(
        w2m_flat, w1_ref[...], preferred_element_type=jnp.float32
    ).astype(out_ref.dtype)


def _round_up(n, m):
    return -(-n // m) * m


def _choose_bm(B, block_b):
    """Examples per block. Prefer BM dividing B (no pad + no output-slice copy)."""
    if B <= block_b:
        return B, B                               # single block, no padding
    hi = max(8, block_b - (block_b % 8))
    lo = max(8, hi // 4)
    for cand in range(hi, lo - 1, -8):            # multiples of 8 (layout rule)
        if B % cand == 0:
            return cand, B
    return hi, _round_up(B, hi)                   # fallback: zero-pad the batch


def saliency_pallas(x, w1, b1, w2, *, block_b=128, max_d_tile=2048):
    """x: (B, C, H, W) float32 -> Jacobians (B, K, C, H, W) float32."""
    B, C, H, W = x.shape
    D = C * H * W
    HID = w1.shape[0]
    K = w2.shape[0]

    x_flat = x.reshape(B, D)

    # relu'(z1) mask precomputed in plain XLA: removes x/b1/full-D W1 from the
    # kernel's VMEM footprint and enables D-tiling of the Jacobian matmul.
    # Note: derivative taken as 0 at z1 == 0 (matches torch; measure-zero).
    z1 = x_flat @ w1.T + b1.reshape(1, HID)
    mask = (z1 > 0).astype(jnp.float32)           # (B, HID)

    # Batch tiling.
    BM, Bp = _choose_bm(B, block_b)
    num_b = Bp // BM
    if Bp != B:
        # Zero mask rows -> zero Jacobians for pad rows (sliced off below).
        mask = jnp.pad(mask, ((0, Bp - B), (0, 0)))

    # D padding (lane-dense, multiple of 128) and optional D-tiling grid axis.
    D_pad = _round_up(D, 128)
    if D_pad <= max_d_tile:
        d_tile = D_pad
    else:
        d_tile = max_d_tile
        D_pad = _round_up(D, d_tile)
    num_d = D_pad // d_tile
    w1_p = w1 if D_pad == D else jnp.pad(w1, ((0, 0), (0, D_pad - D)))

    # VMEM budget for double-buffered blocks (+ live jac intermediate + slack).
    out_blk = BM * K * d_tile * 4
    w1_blk = HID * d_tile * 4
    mask_blk = BM * HID * 4
    w2_blk = K * HID * 4
    vmem_bytes = 2 * (out_blk + w1_blk + mask_blk + w2_blk) + out_blk + (2 << 20)
    vmem_bytes = int(min(max(vmem_bytes, 16 << 20), 64 << 20))

    cost = pl.CostEstimate(
        flops=2 * Bp * K * D_pad * HID + Bp * K * HID,
        transcendentals=0,
        bytes_accessed=4 * (Bp * K * D_pad + Bp * HID + num_b * HID * D_pad + K * HID),
    )

    out2d = pl.pallas_call(
        saliency_kernel,
        out_shape=jax.ShapeDtypeStruct((Bp * K, D_pad), jnp.float32),
        grid_spec=pltpu.PrefetchScalarGridSpec(
            num_scalar_prefetch=0,
            grid=(num_b, num_d),
            in_specs=[
                pl.BlockSpec((BM, HID), lambda b, d: (b, 0)),       # mask rows
                pl.BlockSpec((HID, d_tile), lambda b, d: (0, d)),   # W1 D-tile
                pl.BlockSpec((K, HID), lambda b, d: (0, 0)),        # W2 (resident)
            ],
            out_specs=pl.BlockSpec((BM * K, d_tile), lambda b, d: (b, d)),
        ),
        compiler_params=pltpu.CompilerParams(
            dimension_semantics=("parallel", "parallel"),
            vmem_limit_bytes=vmem_bytes,
        ),
        cost_estimate=cost,
    )(mask, w1_p, w2)

    out = out2d.reshape(Bp, K, D_pad)
    if Bp != B or D_pad != D:
        out = out[:B, :, :D]
    return out.reshape(B, K, C, H, W)


def f_ref(params, x_flat):
    """Pure-JAX reference of the wrapped classifier f (single example)."""
    w1, b1, w2, b2 = params
    z1 = w1 @ x_flat + b1
    h = jnp.maximum(z1, 0.0)
    return w2 @ h + b2


if __name__ == "__main__":
    # Small shapes: batch=2, channels=4, spatial=16x16, hidden=32, classes=8.
    B, C, H, W = 2, 4, 16, 16
    D = C * H * W
    HID, K = 32, 8

    key = jax.random.PRNGKey(0)
    kx, kw1, kb1, kw2, kb2 = jax.random.split(key, 5)

    x = jax.random.normal(kx, (B, C, H, W), dtype=jnp.float32)
    # Deterministic parameter init (stand-in for the wrapped nn.Module f).
    # TODO(synk): Saliency wraps an arbitrary f; this kernel assumes the
    # concrete 2-layer ReLU MLP classifier used previously.
    w1 = jax.random.normal(kw1, (HID, D), dtype=jnp.float32) * 0.05
    b1 = jax.random.normal(kb1, (HID,), dtype=jnp.float32) * 0.05
    w2 = jax.random.normal(kw2, (K, HID), dtype=jnp.float32) * 0.05
    b2 = jax.random.normal(kb2, (K,), dtype=jnp.float32) * 0.05

    grads = saliency_pallas(x, w1, b1, w2)
    grads = jax.block_until_ready(grads)
    assert grads.shape == (B, K, C, H, W)

    # Cross-check against JAX autodiff: vmap(jacrev(f)) — same semantics as
    # torch.func.vmap(torch.func.jacrev(self.f))(x).
    params = (w1, b1, w2, b2)
    ref = jax.vmap(jax.jacrev(lambda xi: f_ref(params, xi.reshape(-1))))(x)
    assert jnp.allclose(grads, ref, atol=1e-4, rtol=1e-4)

    print("KERNEL_OK")
</pallas_src>

<mosaic_0001>
module attributes {stable_mosaic.version = 11 : i64} {
  func.func @saliency_kernel(%arg0: i32, %arg1: i32, %arg2: memref<2x32xf32, #tpu.memory_space<vmem>>, %arg3: memref<32x1024xf32, #tpu.memory_space<vmem>>, %arg4: memref<8x32xf32, #tpu.memory_space<vmem>>, %arg5: memref<16x1024xf32, #tpu.memory_space<vmem>>) attributes {dimension_semantics = [#tpu.dimension_semantics<parallel>, #tpu.dimension_semantics<parallel>], iteration_bounds = array<i64: 1, 1>, scalar_prefetch = 0 : i64, scratch_operands = 0 : i64, tpu.core_type = #tpu.core_type<tc>, window_params = [{transform_indices = @transform_0, window_bounds = array<i64: 2, 32>}, {transform_indices = @transform_1, window_bounds = array<i64: 32, 1024>}, {pipeline_mode = #tpu.pipeline_mode<synchronous>, transform_indices = @transform_2, window_bounds = array<i64: 8, 32>}, {transform_indices = @transform_3, window_bounds = array<i64: 16, 1024>}]} {
    %c0 = arith.constant 0 : index
    %c0_0 = arith.constant 0 : index
    %0 = vector.load %arg2[%c0, %c0_0] : memref<2x32xf32, #tpu.memory_space<vmem>>, vector<2x32xf32>
    %c0_1 = arith.constant 0 : index
    %c0_2 = arith.constant 0 : index
    %1 = vector.load %arg4[%c0_1, %c0_2] : memref<8x32xf32, #tpu.memory_space<vmem>>, vector<8x32xf32>
    %2 = vector.shape_cast %1 : vector<8x32xf32> to vector<1x8x32xf32>
    %3 = vector.shape_cast %0 : vector<2x32xf32> to vector<2x1x32xf32>
    %4 = vector.broadcast %2 : vector<1x8x32xf32> to vector<2x8x32xf32>
    %5 = vector.broadcast %3 : vector<2x1x32xf32> to vector<2x8x32xf32>
    %6 = arith.mulf %4, %5 : vector<2x8x32xf32>
    %7 = vector.shape_cast %6 : vector<2x8x32xf32> to vector<16x32xf32>
    %c0_3 = arith.constant 0 : index
    %c0_4 = arith.constant 0 : index
    %8 = vector.load %arg3[%c0_3, %c0_4] : memref<32x1024xf32, #tpu.memory_space<vmem>>, vector<32x1024xf32>
    %cst = arith.constant dense<0.000000e+00> : vector<16x1024xf32>
    %9 = tpu.matmul %7, %8, %cst {dimension_numbers = #tpu.dot_dimension_numbers<[1], [0], [0], [1], [0, 0, 1, 1], [], []>} : vector<16x32xf32>, vector<32x1024xf32>, vector<16x1024xf32> -> vector<16x1024xf32>
    %c0_5 = arith.constant 0 : index
    %c0_6 = arith.constant 0 : index
    %10 = vector.load %arg5[%c0_5, %c0_6] : memref<16x1024xf32, #tpu.memory_space<vmem>>, vector<16x1024xf32>
    tpu.vector_store %arg5[%c0_5, %c0_6], %9 {strides = array<i32>} : memref<16x1024xf32, #tpu.memory_space<vmem>>, vector<16x1024xf32>,
    return
  }
  func.func @transform_0(%arg0: i32, %arg1: i32) -> (i32, i32) {
    %c0_i32 = arith.constant 0 : i32
    %c0_i32_0 = arith.constant 0 : i32
    return %arg0, %c0_i32 : i32, i32
  }
  func.func @transform_1(%arg0: i32, %arg1: i32) -> (i32, i32) {
    %c0_i32 = arith.constant 0 : i32
    %c0_i32_0 = arith.constant 0 : i32
    return %c0_i32, %arg1 : i32, i32
  }
  func.func @transform_2(%arg0: i32, %arg1: i32) -> (i32, i32) {
    %c0_i32 = arith.constant 0 : i32
    %c0_i32_0 = arith.constant 0 : i32
    %c0_i32_1 = arith.constant 0 : i32
    return %c0_i32, %c0_i32_0 : i32, i32
  }
  func.func @transform_3(%arg0: i32, %arg1: i32) -> (i32, i32) {
    %c0_i32 = arith.constant 0 : i32
    return %arg0, %arg1 : i32, i32
  }
}

</mosaic_0001>

<bundles_post_ra>
// kernel: tpu_custom_call.1
= control target key start
LH: loop header
LB: loop body
LE: loop exit
PB: predicated region body
PF: predicated region fallthrough
CT: control target
= control target key end

     0   :  { %8 = vsyncpa [#allocation3], 0  ;;  %s511_s0 = inlined_call_operand.hbm [shape: f32[2,32], index: 0, kind: input, shape index: {}]   ;;  %s512_s1 = inlined_call_operand.hbm [shape: f32[32,1024], index: 1, kind: input, shape index: {}]   ;;  %s513_s2 = inlined_call_operand.hbm [shape: f32[8,32], index: 2, kind: input, shape index: {}]   ;;  %s514_s3 = inlined_call_operand.hbm [shape: f32[16,1024], index: 3, kind: output, shape index: {}]  }
   0x1   :  { %9 = vsyncpa [#allocation6], 0  ;;  %s26_s14 = sshll.u32 %s512_s1, 4  ;;  %s27_s14 = int_to_ptr.hbm [resolvable:$true] %s26_s14 }
   0x2   :  { %10 = vsyncpa [#allocation4], 0  ;;  %s451_s15 = smov [#allocation5]   ;;  %s16_s19 = sshll.u32 %s511_s0, 4  ;;  %s17_s19 = int_to_ptr.hbm [resolvable:$true] %s16_s19 }
   0x3   :  { %s28_s16 = sshll.u32 %s451_s15, 4  ;;  %s452_s20 = smov 1024   ;;  %s29_s16 = int_to_ptr.vmem [resolvable:$true] %s28_s16 }
   0x4   :  { %s453_s21 = smov 64   ;;  %s454_s22 = smov [#allocation2]  }
   0x5   :  { %34 = dma.hbm_to_vmem [thread:$0]  %s27_s14, 4096, %s29_s16, [#allocation6], %s452_s20, %s452_s20, %s453_s21  }
   0x6   :  { %s18_s23 = sshll.u32 %s454_s22, 4  ;;  %s40_s25 = sshll.u32 %s513_s2, 4  ;;  %s19_s23 = int_to_ptr.vmem [resolvable:$true] %s18_s23  ;;  %s41_s25 = int_to_ptr.hbm [resolvable:$true] %s40_s25 }
   0x7   :  { %21 = dma.hbm_to_vmem [thread:$0]  %s17_s19, 32, %s19_s23, [#allocation3]  }
   0x8   :  { %s455_s26 = smov [#allocation7]  }
   0x9   :  { %s42_s27 = sshll.u32 %s455_s26, 4  ;;  %s43_s27 = int_to_ptr.vmem [resolvable:$true] %s42_s27 }
   0xa   :  { %45 = dma.hbm_to_vmem [thread:$0]  %s41_s25, 128, %s43_s27, [#allocation6]  }
   0xb   :  { %445 = dma.done.wait [#allocation3], 32  }
   0xc   :  { %446 = vsyncadd [#allocation3], 4294967264 }
   0xd   :  { %447 = dma.done.wait [#allocation6], 4224  }
   0xe   :  { %448 = vsyncadd [#allocation6], 4294963072  ;;  %v94_v0 = vld [vmem:[#allocation5 + $0xd0] sm:$0xff]  ;;  %v95_v1 = vld [vmem:[#allocation5 + $0xd8] sm:$0xff]  ;;  %vm100_vm0 = vcmask 261120   ;;  %s456_s0 = smov [#allocation8]  }
   0xf   :  { %v86_v2 = vld [vmem:[#allocation5 + $0x90] sm:$0xff]  ;;  %165 = vmatpush.msra.mxu2 %v94_v0  ;;  %188 = vmatpush.msra.mxu3 %v95_v1  ;;  %v87_v3 = vld [vmem:[#allocation5 + $0x98] sm:$0xff]  ;;  %v92_v6 = vld [vmem:[#allocation5 + $0xc0] sm:$0xff]  ;;  %s311_s2 = sshll.u32 %s456_s0, 4  ;;  %s313_s30 = sshll.u32 %s514_s3, 4  ;;  %s312_s2 = int_to_ptr.vmem [resolvable:$true] %s311_s2  ;;  %s314_s30 = int_to_ptr.hbm [resolvable:$true] %s313_s30 }
  0x10   :  { %v78_v4 = vld [vmem:[#allocation5 + $0x50] sm:$0xff]  ;;  %v79_v5 = vld [vmem:[#allocation5 + $0x58] sm:$0xff]  ;;  %v93_v7 = vld [vmem:[#allocation5 + $0xc8] sm:$0xff]  ;;  %119 = vmatpush.msra.mxu0 %v92_v6 }
  0x11   :  { %166 = vmatpush.msra.mxu2 %v86_v2  ;;  %189 = vmatpush.msra.mxu3 %v87_v3  ;;  %v58_v8 = vld [vmem:[#allocation2] sm:$0x3]  ;;  %v59_v9 = vld [vmem:[#allocation7] sm:$0xff]  ;;  %v70_v10 = vld [vmem:[#allocation5 + $0x10] sm:$0xff] }
  0x12   :  { %142 = vmatpush.msra.mxu1 %v93_v7  ;;  %v71_v11 = vld [vmem:[#allocation5 + $0x18] sm:$0xff]  ;;  %v62_v12 = vperm.slane %v58_v8, 0  ;;  %v84_v13 = vld [vmem:[#allocation5 + $0x80] sm:$0xff]  ;;  %v61_v14 = vrot.slane %v58_v8, 1  ;;  %v85_v15 = vld [vmem:[#allocation5 + $0x88] sm:$0xff] }
  0x13   :  { %167 = vmatpush.msra.mxu2 %v78_v4  ;;  %190 = vmatpush.msra.mxu3 %v79_v5  ;;  %v98_v17 = vld [vmem:[#allocation5 + $0xf0] sm:$0xff]  ;;  %v99_v18 = vld [vmem:[#allocation5 + $0xf8] sm:$0xff]  ;;  %v76_v19 = vld [vmem:[#allocation5 + $0x40] sm:$0xff] }
  0x14   :  { %v66_v16 = vmul.f32 %v62_v12, %v59_v9  ;;  %120 = vmatpush.msra.mxu0 %v84_v13  ;;  %143 = vmatpush.msra.mxu1 %v85_v15  ;;  %v77_v20 = vld [vmem:[#allocation5 + $0x48] sm:$0xff]  ;;  %v90_v21 = vld [vmem:[#allocation5 + $0xb0] sm:$0xff]  ;;  %v91_v22 = vld [vmem:[#allocation5 + $0xb8] sm:$0xff]  ;;  %v63_v23 = vperm.slane %v61_v14, 0 }
  0x15   :  { %168 = vmatpush.msra.mxu2 %v70_v10  ;;  %191 = vmatpush.msra.mxu3 %v71_v11  ;;  %v68_v24 = vld [vmem:[#allocation5] sm:$0xff]  ;;  %v69_v25 = vld [vmem:[#allocation5 + $0x8] sm:$0xff]  ;;  %v82_v29 = vld [vmem:[#allocation5 + $0x70] sm:$0xff] }
  0x16   :  { %331 = vmatmul.msk.f32.vlgmr.msra.gmra.mxu2 %vm100_vm0, %v66_v16  ;;  %333 = vmatmul.msk.f32.vlgmr.msra.gmra.mxu3 %vm100_vm0, %v66_v16  ;;  %v96_v26 = vld [vmem:[#allocation5 + $0xe0] sm:$0xff]  ;;  %v97_v27 = vld [vmem:[#allocation5 + $0xe8] sm:$0xff]  ;;  %v67_v28 = vmul.f32 %v63_v23, %v59_v9  ;;  %v83_v30 = vld [vmem:[#allocation5 + $0x78] sm:$0xff] }
  0x17   :  { %257 = vmatpush.msrb.mxu2 %v98_v17  ;;  %280 = vmatpush.msrb.mxu3 %v99_v18  ;;  %v88_v31 = vld [vmem:[#allocation5 + $0xa0] sm:$0xff]  ;;  %v89_v32 = vld [vmem:[#allocation5 + $0xa8] sm:$0xff]  ;;  %v74_v33 = vld [vmem:[#allocation5 + $0x30] sm:$0xff] }
  0x18   :  { %121 = vmatpush.msra.mxu0 %v76_v19  ;;  %144 = vmatpush.msra.mxu1 %v77_v20  ;;  %v75_v34 = vld [vmem:[#allocation5 + $0x38] sm:$0xff]  ;;  %v80_v35 = vld [vmem:[#allocation5 + $0x60] sm:$0xff]  ;;  %v81_v36 = vld [vmem:[#allocation5 + $0x68] sm:$0xff] }
  0x19   :  { %258 = vmatpush.msrb.mxu2 %v90_v21  ;;  %281 = vmatpush.msrb.mxu3 %v91_v22  ;;  %v72_v37 = vld [vmem:[#allocation5 + $0x20] sm:$0xff]  ;;  %v73_v38 = vld [vmem:[#allocation5 + $0x28] sm:$0xff] }
  0x1a   :  { %122 = vmatpush.msra.mxu0 %v68_v24  ;;  %145 = vmatpush.msra.mxu1 %v69_v25 }
  0x1b   :  { %327 = vmatmul.msk.f32.vlgmr.msra.gmra.mxu0 %vm100_vm0, %v66_v16  ;;  %329 = vmatmul.msk.f32.vlgmr.msra.gmra.mxu1 %vm100_vm0, %v66_v16 }
  0x1c   :  { %211 = vmatpush.msrb.mxu0 %v96_v26  ;;  %234 = vmatpush.msrb.mxu1 %v97_v27 }
  0x1d   :  { %259 = vmatpush.msrb.mxu2 %v82_v29  ;;  %282 = vmatpush.msrb.mxu3 %v83_v30 }
  0x1e   :  { %332 = vmatmul.msk.f32.gmra.mxu2 %vm100_vm0, %v67_v28  ;;  %334 = vmatmul.msk.f32.gmra.mxu3 %vm100_vm0, %v67_v28 }
  0x1f   :  { %212 = vmatpush.msrb.mxu0 %v88_v31  ;;  %235 = vmatpush.msrb.mxu1 %v89_v32 }
  0x20   :  { %260 = vmatpush.msrb.mxu2 %v74_v33  ;;  %283 = vmatpush.msrb.mxu3 %v75_v34 }
  0x21   :  { %213 = vmatpush.msrb.mxu0 %v80_v35  ;;  %236 = vmatpush.msrb.mxu1 %v81_v36 }
  0x23   :  { %328 = vmatmul.msk.f32.gmra.mxu0 %vm100_vm0, %v67_v28  ;;  %330 = vmatmul.msk.f32.gmra.mxu1 %vm100_vm0, %v67_v28 }
  0x24   :  { %214 = vmatpush.msrb.mxu0 %v72_v37  ;;  %237 = vmatpush.msrb.mxu1 %v73_v38 }
  0x26   :  { %339 = vmatmul.msk.f32.vlgmr.msrb.gmra.mxu2 %vm100_vm0, %v66_v16  ;;  %341 = vmatmul.msk.f32.vlgmr.msrb.gmra.mxu3 %vm100_vm0, %v66_v16 }
  0x2b   :  { %335 = vmatmul.msk.f32.vlgmr.msrb.gmra.mxu0 %vm100_vm0, %v66_v16  ;;  %337 = vmatmul.msk.f32.vlgmr.msrb.gmra.mxu1 %vm100_vm0, %v66_v16 }
  0x2e   :  { %340 = vmatmul.msk.f32.gmra.mxu2 %vm100_vm0, %v67_v28  ;;  %342 = vmatmul.msk.f32.gmra.mxu3 %vm100_vm0, %v67_v28 }
  0x33   :  { %336 = vmatmul.msk.f32.gmra.mxu0 %vm100_vm0, %v67_v28  ;;  %338 = vmatmul.msk.f32.gmra.mxu1 %vm100_vm0, %v67_v28 }
  0x98   :  { %v124_v39 = vpop.f32.mrf.mxu0  ;;  %v147_v40 = vpop.f32.mrf.mxu1 }
  0x99   :  { %291 = vst [vmem:[#allocation8] sm:$0xff] %v124_v39  ;;  %v170_v41 = vpop.f32.mrf.mxu2  ;;  %v193_v42 = vpop.f32.mrf.mxu3 }
  0x9a   :  { %292 = vst [vmem:[#allocation8 + $0x8] sm:$0xff] %v147_v40 }
  0x9b   :  { %293 = vst [vmem:[#allocation8 + $0x10] sm:$0xff] %v170_v41 }
  0x9c   :  { %294 = vst [vmem:[#allocation8 + $0x18] sm:$0xff] %v193_v42 }
  0xa0   :  { %v127_v43 = vpop.f32.mrf.mxu0  ;;  %v150_v44 = vpop.f32.mrf.mxu1 }
  0xa1   :  { %299 = vst [vmem:[#allocation8 + $0x40] sm:$0xff] %v127_v43  ;;  %v173_v45 = vpop.f32.mrf.mxu2  ;;  %v196_v46 = vpop.f32.mrf.mxu3 }
  0xa2   :  { %300 = vst [vmem:[#allocation8 + $0x48] sm:$0xff] %v150_v44 }
  0xa3   :  { %301 = vst [vmem:[#allocation8 + $0x50] sm:$0xff] %v173_v45 }
  0xa4   :  { %302 = vst [vmem:[#allocation8 + $0x58] sm:$0xff] %v196_v46 }
  0xa8   :  { %v216_v47 = vpop.f32.mrf.mxu0  ;;  %v239_v48 = vpop.f32.mrf.mxu1 }
  0xa9   :  { %295 = vst [vmem:[#allocation8 + $0x20] sm:$0xff] %v216_v47  ;;  %v262_v49 = vpop.f32.mrf.mxu2  ;;  %v285_v50 = vpop.f32.mrf.mxu3 }
  0xaa   :  { %296 = vst [vmem:[#allocation8 + $0x28] sm:$0xff] %v239_v48 }
  0xab   :  { %297 = vst [vmem:[#allocation8 + $0x30] sm:$0xff] %v262_v49 }
  0xac   :  { %298 = vst [vmem:[#allocation8 + $0x38] sm:$0xff] %v285_v50 }
  0xb0   :  { %v219_v51 = vpop.f32.mrf.mxu0  ;;  %v242_v52 = vpop.f32.mrf.mxu1 }
  0xb1   :  { %303 = vst [vmem:[#allocation8 + $0x60] sm:$0xff] %v219_v51  ;;  %v265_v53 = vpop.f32.mrf.mxu2  ;;  %v288_v54 = vpop.f32.mrf.mxu3 }
  0xb2   :  { %304 = vst [vmem:[#allocation8 + $0x68] sm:$0xff] %v242_v52 }
  0xb3   :  { %305 = vst [vmem:[#allocation8 + $0x70] sm:$0xff] %v265_v53 }
  0xb4   :  { %306 = vst [vmem:[#allocation8 + $0x78] sm:$0xff] %v288_v54 }
  0xb5   :  { %319 = dma.vmem_to_hbm [thread:$0]  %s312_s2, 2048, %s314_s30, [#allocation4], %s452_s20, %s452_s20, %s453_s21  }
  0xb6   :  { %449 = dma.done.wait [#allocation4], 2048  }
  0xb7   :  { %450 = vsyncadd [#allocation4], 4294965248 }
  0xb8   :  { %324 = vsyncpa [#allocation3], 1 }
  0xb9   :  { %325 = vsyncpa [#allocation6], 1 }
  0xba   :  { %326 = vsyncpa [#allocation4], 1 }

</bundles_post_ra>
